<compile_context>
chip_gen: v7x
topology: tpu7x:2x2x1
jax: 0.10.0
libtpu: 0.0.40
codegen_flags: <defaults>
</compile_context>

<pallas_src>
import functools
import math

import jax
import jax.numpy as jnp
import numpy as np
from jax.experimental import pallas as pl
from jax.experimental.pallas import tpu as pltpu


LANE = 128             # pad channel dims to multiples of this (lane-dense stores)
MAX_BATCH_TILE = 1024  # cap on rows per grid step (amortizes per-step overhead)


# ----------------------------------------------------------------------------
# Skeleton topology helpers (plain Python glue, mirrors find_neighbor_joint).
# ----------------------------------------------------------------------------
def find_neighbor_joint(parents, threshold):
    n = len(parents)
    dist = np.full((n, n), 100000, dtype=np.int64)
    for i, p in enumerate(parents):
        dist[i, i] = 0
        if i != 0:
            dist[i, p] = dist[p, i] = 1
    # Floyd-Warshall
    for k in range(n):
        for i in range(n):
            for j in range(n):
                if dist[i, k] + dist[k, j] < dist[i, j]:
                    dist[i, j] = dist[i, k] + dist[k, j]
    neighbor_list = []
    for i in range(n):
        neighbor_list.append([j for j in range(n) if dist[i, j] <= threshold])
    return neighbor_list


def build_skeleton_mask(neighbor_list, in_channels, out_channels):
    """0/1 mask of shape (out_channels, in_channels), per-joint block sparsity."""
    n_joints = len(neighbor_list)
    in_per = in_channels // n_joints
    out_per = out_channels // n_joints
    mask = np.zeros((out_channels, in_channels), dtype=np.float32)
    for i, neigh in enumerate(neighbor_list):
        cols = []
        for k in neigh:
            cols.extend(range(k * in_per, (k + 1) * in_per))
        mask[i * out_per:(i + 1) * out_per, cols] = 1.0
    return mask


def _round_up(x, m):
    return (x + m - 1) // m * m


def _choose_batch_tiling(batch):
    """Pick (b_pad, batch_tile).

    Always >= 2 grid steps (so the "parallel" batch axis can shard across v7x's
    two TensorCores); tiles grow up to MAX_BATCH_TILE rows for large batches so
    the ~0.35 us fixed per-grid-step cost is amortized.  128-row granularity
    keeps sublane/lane density and unmasked stores.
    """
    b_pad = _round_up(max(batch, 2 * LANE), LANE)
    if b_pad <= 2 * MAX_BATCH_TILE:
        tile = _round_up((b_pad + 1) // 2, LANE)      # exactly 2 steps
    else:
        tile = MAX_BATCH_TILE
    b_pad = _round_up(b_pad, tile)
    return b_pad, tile


# ----------------------------------------------------------------------------
# Fused Pallas kernel: all layers in one invocation, activations stay in VMEM.
#   x_ref: (TB, C)      bf16  padded input tile
#   w_ref: (L, C, C)    bf16  pre-masked, pre-transposed (in, out) weights
#   b_ref: (L, 1, C)    f32   padded biases
#   o_ref: (TB, C)      bf16  padded output tile (lane-dense, half the HBM bytes of f32)
# ----------------------------------------------------------------------------
def fused_mlp_kernel(x_ref, w_ref, b_ref, o_ref, *, n_layers):
    h = x_ref[...]                                            # bf16 (TB, C)
    for l in range(n_layers):                                 # static unroll
        y = jnp.dot(h, w_ref[l], preferred_element_type=jnp.float32)  # MXU, f32 acc
        y = y + b_ref[l]                                      # (1, C) broadcast, f32
        if l < n_layers - 1:
            y = jnp.maximum(y, 0.2 * y)                       # LeakyReLU(0.2): mul+max
        h = y.astype(jnp.bfloat16)                            # bf16 feed / bf16 store
    o_ref[...] = h                                            # unmasked vst, bf16


def prepare_skeleton_params(params):
    """One-time prep (hoisted out of the per-call path):
    fold the static skeleton mask into the weights, pre-transpose to (in, out),
    zero-pad channels to a uniform 128-lane multiple, stack layers, cast to bf16.

    Zero padding is self-consistent: padded lanes stay exactly 0 through every
    layer (0-weights, 0-bias, LeakyReLU(0)=0), so the final slice is exact.
    """
    chans = (params[0][0].shape[1],) + tuple(w.shape[0] for (w, _, _) in params)
    c_pad = _round_up(max(chans), LANE)
    w_stack, b_stack = [], []
    for (w, m, b) in params:
        wt = (jnp.asarray(w) * jnp.asarray(m)).T                    # (in, out), f32
        wt = jnp.pad(wt, ((0, c_pad - wt.shape[0]), (0, c_pad - wt.shape[1])))
        w_stack.append(wt)
        bb = jnp.reshape(jnp.asarray(b), (1, -1))
        bb = jnp.pad(bb, ((0, 0), (0, c_pad - bb.shape[1])))        # padded bias stays 0
        b_stack.append(bb)
    w_all = jnp.stack(w_stack).astype(jnp.bfloat16)                 # (L, c_pad, c_pad)
    b_all = jnp.stack(b_stack).astype(jnp.float32)                  # (L, 1, c_pad)
    return w_all, b_all, chans


@functools.partial(jax.jit, static_argnames=("chans",))
def mlp_skeleton_forward(x, w_all, b_all, *, chans):
    """x: (B, chans[0]) f32. w_all/b_all from prepare_skeleton_params. Returns bf16."""
    n_layers, c_pad, _ = w_all.shape
    B = x.shape[0]
    b_pad, batch_tile = _choose_batch_tiling(B)
    n_steps = b_pad // batch_tile

    # Only per-call prep: pad + cast the input.
    xp = jnp.pad(x, ((0, b_pad - B), (0, c_pad - chans[0]))).astype(jnp.bfloat16)

    # Advisory cost estimate from the REAL (unpadded) problem.
    flops = int(2 * B * sum(chans[i] * chans[i + 1] for i in range(n_layers)))
    bytes_accessed = int(
        B * chans[0] * 2
        + sum(chans[i] * chans[i + 1] for i in range(n_layers)) * 2
        + sum(chans[1:]) * 4
        + B * chans[-1] * 2)

    # VMEM sizing: resident weights/biases + double-buffered x/out tiles, 2x headroom.
    vmem_need = 2 * (w_all.size * 2 + b_all.size * 4
                     + batch_tile * c_pad * 2      # x tile, bf16
                     + batch_tile * c_pad * 2)     # out tile, bf16
    vmem_limit = int(min(max(4 * 1024 * 1024, 2 * vmem_need), 96 * 1024 * 1024))

    kernel = functools.partial(fused_mlp_kernel, n_layers=n_layers)
    out = pl.pallas_call(
        kernel,
        out_shape=jax.ShapeDtypeStruct((b_pad, c_pad), jnp.bfloat16),
        grid=(n_steps,),
        in_specs=[
            pl.BlockSpec((batch_tile, c_pad), lambda i: (i, 0)),             # x tile
            pl.BlockSpec((n_layers, c_pad, c_pad), lambda i: (0, 0, 0)),     # weights (resident)
            pl.BlockSpec((n_layers, 1, c_pad), lambda i: (0, 0, 0)),         # biases (resident)
        ],
        out_specs=pl.BlockSpec((batch_tile, c_pad), lambda i: (i, 0)),
        compiler_params=pltpu.CompilerParams(
            dimension_semantics=("parallel",),
            vmem_limit_bytes=vmem_limit),
        cost_estimate=pl.CostEstimate(
            flops=flops, transcendentals=0, bytes_accessed=bytes_accessed),
    )(xp, w_all, b_all)

    return out[:B, :chans[-1]]


def init_params(key, layers, neighbor_list):
    """Deterministic init mirroring SkeletonLinear.reset_parameters in spirit:
    uniform weights (masked to the skeleton sparsity pattern) + uniform bias."""
    params = []
    for i in range(1, len(layers)):
        in_c, out_c = layers[i - 1], layers[i]
        key, kw, kb = jax.random.split(key, 3)
        mask = jnp.asarray(build_skeleton_mask(neighbor_list, in_c, out_c))
        bound = 1.0 / math.sqrt(in_c)
        w = jax.random.uniform(kw, (out_c, in_c), jnp.float32, -bound, bound)
        b = jax.random.uniform(kb, (1, out_c), jnp.float32, -bound, bound)
        params.append((w, mask, b))
    return params


if __name__ == "__main__":
    # Small synthetic skeleton: 4 joints in a chain, neighbor threshold = 2.
    parents = [-1, 0, 1, 2]
    threshold = 2
    neighbor_list = find_neighbor_joint(parents, threshold)

    # layers[i] must be divisible by number of joints (4): 24 -> 32 -> 16.
    layers = [24, 32, 16]
    batch = 256   # e.g. frames folded into the batch dimension

    key = jax.random.PRNGKey(0)
    key, kx = jax.random.split(key)
    x = jax.random.normal(kx, (batch, layers[0]), dtype=jnp.float32)
    params = init_params(key, layers, neighbor_list)

    # One-time prep (would be cached alongside the checkpoint in a real pipeline).
    w_all, b_all, chans = prepare_skeleton_params(params)

    out = mlp_skeleton_forward(x, w_all, b_all, chans=chans)
    out = jax.block_until_ready(out)

    # Pure-JAX reference matching the kernel numerics
    # (bf16 MXU inputs, f32 accumulate, bf16 inter-layer + output cast).
    h = x.astype(jnp.bfloat16)
    for idx, (w, m, b) in enumerate(params):
        wt = ((w * m).T).astype(jnp.bfloat16)
        y = jnp.dot(h, wt, preferred_element_type=jnp.float32) + jnp.reshape(b, (1, -1))
        if idx < len(params) - 1:
            y = jnp.maximum(y, 0.2 * y)
        h = y.astype(jnp.bfloat16)
    ref = h

    assert out.shape == (batch, layers[-1])
    assert out.dtype == jnp.bfloat16
    np.testing.assert_allclose(np.asarray(out, dtype=np.float32),
                               np.asarray(ref, dtype=np.float32),
                               rtol=2e-2, atol=2e-2)

    # TODO(synk): training utilities (optimizer, epoch counter, save/load checkpoints)
    # of MLPSkeleton are host-side bookkeeping and have no Pallas equivalent; only
    # forward() is ported.
    print("KERNEL_OK")
</pallas_src>

<mosaic_0001>
module attributes {stable_mosaic.version = 11 : i64} {
  func.func @fused_mlp_kernel(%arg0: i32, %arg1: memref<128x128xbf16, #tpu.memory_space<vmem>>, %arg2: memref<2x128x128xbf16, #tpu.memory_space<vmem>>, %arg3: memref<2x1x128xf32, #tpu.memory_space<vmem>>, %arg4: memref<128x128xbf16, #tpu.memory_space<vmem>>) attributes {dimension_semantics = [#tpu.dimension_semantics<parallel>], iteration_bounds = array<i64: 2>, scalar_prefetch = 0 : i64, scratch_operands = 0 : i64, tpu.core_type = #tpu.core_type<tc>, window_params = [{transform_indices = @transform_0, window_bounds = array<i64: 128, 128>}, {pipeline_mode = #tpu.pipeline_mode<synchronous>, transform_indices = @transform_1, window_bounds = array<i64: 2, 128, 128>}, {pipeline_mode = #tpu.pipeline_mode<synchronous>, transform_indices = @transform_2, window_bounds = array<i64: 2, 1, 128>}, {transform_indices = @transform_3, window_bounds = array<i64: 128, 128>}]} {
    %c0 = arith.constant 0 : index
    %c0_0 = arith.constant 0 : index
    %0 = vector.load %arg1[%c0, %c0_0] : memref<128x128xbf16, #tpu.memory_space<vmem>>, vector<128x128xbf16>
    %c0_1 = arith.constant 0 : index
    %c0_2 = arith.constant 0 : index
    %c0_3 = arith.constant 0 : index
    %1 = vector.load %arg2[%c0_1, %c0_2, %c0_3] : memref<2x128x128xbf16, #tpu.memory_space<vmem>>, vector<1x128x128xbf16>
    %2 = vector.shape_cast %1 : vector<1x128x128xbf16> to vector<128x128xbf16>
    %cst = arith.constant dense<0.000000e+00> : vector<128x128xf32>
    %3 = tpu.matmul %0, %2, %cst {dimension_numbers = #tpu.dot_dimension_numbers<[1], [0], [0], [1], [0, 0, 1, 1], [], []>} : vector<128x128xbf16>, vector<128x128xbf16>, vector<128x128xf32> -> vector<128x128xf32>
    %c0_4 = arith.constant 0 : index
    %c0_5 = arith.constant 0 : index
    %c0_6 = arith.constant 0 : index
    %4 = vector.load %arg3[%c0_4, %c0_5, %c0_6] : memref<2x1x128xf32, #tpu.memory_space<vmem>>, vector<1x1x128xf32>
    %5 = vector.shape_cast %4 : vector<1x1x128xf32> to vector<1x128xf32>
    %6 = vector.broadcast %5 : vector<1x128xf32> to vector<128x128xf32>
    %7 = arith.addf %3, %6 : vector<128x128xf32>
    %cst_7 = arith.constant 2.000000e-01 : f32
    %8 = vector.broadcast %cst_7 : f32 to vector<128x128xf32>
    %9 = arith.mulf %8, %7 : vector<128x128xf32>
    %10 = arith.maximumf %7, %9 : vector<128x128xf32>
    %11 = arith.truncf %10 : vector<128x128xf32> to vector<128x128xbf16>
    %c1 = arith.constant 1 : index
    %c0_8 = arith.constant 0 : index
    %c0_9 = arith.constant 0 : index
    %12 = vector.load %arg2[%c1, %c0_8, %c0_9] : memref<2x128x128xbf16, #tpu.memory_space<vmem>>, vector<1x128x128xbf16>
    %13 = vector.shape_cast %12 : vector<1x128x128xbf16> to vector<128x128xbf16>
    %cst_10 = arith.constant dense<0.000000e+00> : vector<128x128xf32>
    %14 = tpu.matmul %11, %13, %cst_10 {dimension_numbers = #tpu.dot_dimension_numbers<[1], [0], [0], [1], [0, 0, 1, 1], [], []>} : vector<128x128xbf16>, vector<128x128xbf16>, vector<128x128xf32> -> vector<128x128xf32>
    %c1_11 = arith.constant 1 : index
    %c0_12 = arith.constant 0 : index
    %c0_13 = arith.constant 0 : index
    %15 = vector.load %arg3[%c1_11, %c0_12, %c0_13] : memref<2x1x128xf32, #tpu.memory_space<vmem>>, vector<1x1x128xf32>
    %16 = vector.shape_cast %15 : vector<1x1x128xf32> to vector<1x128xf32>
    %17 = vector.broadcast %16 : vector<1x128xf32> to vector<128x128xf32>
    %18 = arith.addf %14, %17 : vector<128x128xf32>
    %19 = arith.truncf %18 : vector<128x128xf32> to vector<128x128xbf16>
    %c0_14 = arith.constant 0 : index
    %c0_15 = arith.constant 0 : index
    %20 = vector.load %arg4[%c0_14, %c0_15] : memref<128x128xbf16, #tpu.memory_space<vmem>>, vector<128x128xbf16>
    tpu.vector_store %arg4[%c0_14, %c0_15], %19 {strides = array<i32>} : memref<128x128xbf16, #tpu.memory_space<vmem>>, vector<128x128xbf16>,
    return
  }
  func.func @transform_0(%arg0: i32) -> (i32, i32) {
    %c0_i32 = arith.constant 0 : i32
    %c0_i32_0 = arith.constant 0 : i32
    return %arg0, %c0_i32 : i32, i32
  }
  func.func @transform_1(%arg0: i32) -> (i32, i32, i32) {
    %c0_i32 = arith.constant 0 : i32
    %c0_i32_0 = arith.constant 0 : i32
    %c0_i32_1 = arith.constant 0 : i32
    %c0_i32_2 = arith.constant 0 : i32
    return %c0_i32, %c0_i32_0, %c0_i32_1 : i32, i32, i32
  }
  func.func @transform_2(%arg0: i32) -> (i32, i32, i32) {
    %c0_i32 = arith.constant 0 : i32
    %c0_i32_0 = arith.constant 0 : i32
    %c0_i32_1 = arith.constant 0 : i32
    %c0_i32_2 = arith.constant 0 : i32
    return %c0_i32, %c0_i32_0, %c0_i32_1 : i32, i32, i32
  }
  func.func @transform_3(%arg0: i32) -> (i32, i32) {
    %c0_i32 = arith.constant 0 : i32
    %c0_i32_0 = arith.constant 0 : i32
    return %arg0, %c0_i32 : i32, i32
  }
}

</mosaic_0001>

<bundles_post_ra>
// kernel: mlp_skeleton_forward.1
= control target key start
LH: loop header
LB: loop body
LE: loop exit
PB: predicated region body
PF: predicated region fallthrough
CT: control target
= control target key end

     0   :  { %s1042_s12 = smov 0   ;;  %s1158_s0 = inlined_call_operand.vmem [shape: bf16[256,128], index: 0, kind: input, shape index: {}]   ;;  %s1159_s1 = inlined_call_operand.vmem [shape: bf16[2,128,128], index: 1, kind: input, shape index: {}]   ;;  %s1160_s2 = inlined_call_operand.vmem [shape: f32[2,1,128], index: 2, kind: input, shape index: {}]   ;;  %s1161_s3 = inlined_call_operand.vmem [shape: bf16[256,128], index: 3, kind: output, shape index: {}]  }
   0x1 LB: > { %s753_s13 = sadd.s32 4294967295, %s1020_s12   ;;  %p757_p0 = scmp.ge.s32.totalorder %s1020_s12, 1  ;;  %s1020_s12 = sphi %s1042_s12, %s13_s12  }
   0x2   : > { %p138_p1 = scmp.lt.s32.totalorder %s1020_s12, 3 }
   0x4   : > { %p139_p2 = pnand %p757_p0, %p138_p1 }
   0x5   : > { %v990_v0 = vld [vmem:[%s1159_s1] sm:$0xff] (!%p139_p2)   ;;  %s758_s16 = sshll.u32 (!%p139_p2), %s753_s13, 4  ;;  %v991_v1 = vld [vmem:[%s1159_s1 + $0x8] sm:$0xff] (!%p139_p2)   ;;  %v992_v2 = vld [vmem:[%s1159_s1 + $0x10] sm:$0xff] (!%p139_p2)  }
   0x6   : > { %142 = sbr.rel (%p139_p2) target bundleno = 506 (0x1fa), region = 32  ;;  %p163_p3 = scmp.lt.s32.totalorder (!%p139_p2), %s758_s16, 31  ;;  %918 = vmatprep.subr.bf16.mxu0 (!%p139_p2), %v990_v0  ;;  %v993_v3 = vld [vmem:[%s1159_s1 + $0x18] sm:$0xff] (!%p139_p2)   ;;  %v994_v5 = vld [vmem:[%s1159_s1 + $0x20] sm:$0xff] (!%p139_p2)   ;;  %v995_v6 = vld [vmem:[%s1159_s1 + $0x28] sm:$0xff] (!%p139_p2)  }
   0x7   : > { %919 = vmatpush3.bf16.msra.mxu0 (!%p139_p2), %v990_v0  ;;  %v1006_v7 = vld [vmem:[%s1159_s1 + $0x40] sm:$0xff] (!%p139_p2)   ;;  %v1007_v8 = vld [vmem:[%s1159_s1 + $0x48] sm:$0xff] (!%p139_p2)   ;;  %v996_v9 = vld [vmem:[%s1159_s1 + $0x30] sm:$0xff] (!%p139_p2)  }
   0x8   : > { %920 = vmatprep.subr.bf16.mxu0 (!%p139_p2), %v991_v1  ;;  %950 = vmatprep.subr.bf16.mxu1 (!%p139_p2), %v1006_v7  ;;  %v1008_v10 = vld [vmem:[%s1159_s1 + $0x50] sm:$0xff] (!%p139_p2)   ;;  %v997_v11 = vld [vmem:[%s1159_s1 + $0x38] sm:$0xff] (!%p139_p2)   ;;  %v1010_v13 = vld [vmem:[%s1159_s1 + $0x60] sm:$0xff] (!%p139_p2)  }
   0x9   : > { %951 = vmatpush3.bf16.msra.mxu1 (!%p139_p2), %v1006_v7  ;;  %v1009_v12 = vld [vmem:[%s1159_s1 + $0x58] sm:$0xff] (!%p139_p2)   ;;  %v1011_v21 = vld [vmem:[%s1159_s1 + $0x68] sm:$0xff] (!%p139_p2)   ;;  %v1012_v22 = vld [vmem:[%s1159_s1 + $0x70] sm:$0xff] (!%p139_p2)  }
   0xa   : > { %952 = vmatprep.subr.bf16.mxu1 (!%p139_p2), %v1007_v8  ;;  %v1013_v23 = vld [vmem:[%s1159_s1 + $0x78] sm:$0xff] (!%p139_p2)   ;;  %v1119_v24 = vld [vmem:[%s1160_s2] ss:$0 sm:$0xff] (!%p139_p2) }
   0xb   : > { %921 = vmatpush3.bf16.msra.mxu0 (!%p139_p2), %v991_v1 }
   0xc   : > { %922 = vmatprep.subr.bf16.mxu0 (!%p139_p2), %v992_v2 }
   0xd   : > { %s1163_s16 = smov (!%p163_p3, %s758_s16), 31  ;;  %953 = vmatpush3.bf16.msra.mxu1 %v1007_v8 }
   0xe   : > { %s759_s21 = sshll.u32 %s1163_s16, 2  ;;  %954 = vmatprep.subr.bf16.mxu1 %v1008_v10 }
   0xf   : > { %s1067_s24 = scalar_lea.vmem %s1158_s0, %s759_s21  ;;  %923 = vmatpush3.bf16.msra.mxu0 %v992_v2  ;;  %s1145_s6 = scalar_lea.vmem %s1161_s3, %s759_s21 }
  0x10   : > { %v998_v4 = vld [vmem:[%s1067_s24] sm:$0xff]   ;;  %924 = vmatprep.subr.bf16.mxu0 %v993_v3  ;;  %v999_v14 = vld [vmem:[%s1067_s24 + $0x8] sm:$0xff]   ;;  %v1000_v15 = vld [vmem:[%s1067_s24 + $0x10] sm:$0xff]  }
  0x11   : > { %934 = vmatprep.mubr.bf16.mxu0 %v998_v4  ;;  %955 = vmatpush3.bf16.msra.mxu1 %v1008_v10  ;;  %v1001_v16 = vld [vmem:[%s1067_s24 + $0x18] sm:$0xff]   ;;  %v1002_v17 = vld [vmem:[%s1067_s24 + $0x20] sm:$0xff]   ;;  %v1003_v18 = vld [vmem:[%s1067_s24 + $0x28] sm:$0xff]  }
  0x12   : > { %956 = vmatprep.subr.bf16.mxu1 %v1009_v12  ;;  %v1004_v19 = vld [vmem:[%s1067_s24 + $0x30] sm:$0xff]   ;;  %v1005_v20 = vld [vmem:[%s1067_s24 + $0x38] sm:$0xff]  }
  0x13   : > { %925 = vmatpush3.bf16.msra.mxu0 %v993_v3 }
  0x14   : > { %926 = vmatprep.subr.bf16.mxu0 %v994_v5 }
  0x15   : > { %957 = vmatpush3.bf16.msra.mxu1 %v1009_v12 }
  0x16   : > { %958 = vmatprep.subr.bf16.mxu1 %v1010_v13 }
  0x17   : > { %927 = vmatpush3.bf16.msra.mxu0 %v994_v5 }
  0x18   : > { %928 = vmatprep.subr.bf16.mxu0 %v995_v6 }
  0x19   : > { %959 = vmatpush3.bf16.msra.mxu1 %v1010_v13 }
  0x1a   : > { %960 = vmatprep.subr.bf16.mxu1 %v1011_v21 }
  0x1b   : > { %929 = vmatpush3.bf16.msra.mxu0 %v995_v6 }
  0x1c   : > { %930 = vmatprep.subr.bf16.mxu0 %v996_v9 }
  0x1d   : > { %961 = vmatpush3.bf16.msra.mxu1 %v1011_v21 }
  0x1e   : > { %962 = vmatprep.subr.bf16.mxu1 %v1012_v22 }
  0x1f   : > { %931 = vmatpush3.bf16.msra.mxu0 %v996_v9 }
  0x20   : > { %932 = vmatprep.subr.bf16.mxu0 %v997_v11 }
  0x21   : > { %963 = vmatpush3.bf16.msra.mxu1 %v1012_v22 }
  0x22   : > { %964 = vmatprep.subr.bf16.mxu1 %v1013_v23 }
  0x23   : > { %933 = vmatpush3.bf16.msra.mxu0 %v997_v11 }
  0x25   : > { %965 = vmatpush3.bf16.msra.mxu1 %v1013_v23 }
  0x26   : > { %935 = vmatmul.mubr.bf16.vlgmr.msra.gmra.mrb[0].mxu0 %v999_v14 }
  0x27   : > { %938 = vmatprep.mubr.bf16.mxu0 %v1000_v15 }
  0x2e   : > { %939 = vmatmul.mubr.bf16.gmra.mrb[4].mxu0 %v1001_v16 }
  0x2f   : > { %942 = vmatprep.mubr.bf16.mxu0 %v1002_v17 }
  0x36   : > { %943 = vmatmul.mubr.bf16.gmra.mrb[8].mxu0 %v1003_v18 }
  0x37   : > { %946 = vmatprep.mubr.bf16.mxu0 %v1004_v19 }
  0x3e   : > { %947 = vmatmul.mubr.bf16.gmra.mrb[12].mxu0 %v1005_v20 }
  0xf9   : > { %v936_v25 = vpop.f32.mrb[0].mxu0 }
  0xfa   : > { %v353_v26 = vadd.f32 %v936_v25, %v1119_v24  ;;  %v344_v27 = vpop.f32.mrb[1].mxu0 }
  0xfb   : > { %v345_v28 = vadd.f32 %v1119_v24, %v344_v27  ;;  %v937_v29 = vpop.f32.mrb[2].mxu0 }
  0xfc   : > { %v409_v30 = vmul.f32 0.2, %v353_v26  ;;  %v356_v31 = vadd.f32 %v937_v29, %v1119_v24  ;;  %v347_v32 = vpop.f32.mrb[3].mxu0 }
  0xfd   : > { %v407_v33 = vmul.f32 0.2, %v345_v28  ;;  %v348_v34 = vadd.f32 %v1119_v24, %v347_v32 }
  0xfe   : > { %v410_v35 = vmul.f32 0.2, %v356_v31  ;;  %v425_v37 = vmax.f32 %v353_v26, %v409_v30 }
  0xff   : > { %v408_v36 = vmul.f32 0.2, %v348_v34  ;;  %v423_v40 = vmax.f32 %v345_v28, %v407_v33 }
 0x100   : > { %v426_v38 = vmax.f32 %v356_v31, %v410_v35  ;;  %v796_v35 = vld [vmem:[%s1160_s2 + $0x1] ss:$0 sm:$0xff] }
 0x101   : > { %v940_v39 = vpop.f32.mrb[4].mxu0  ;;  %v424_v41 = vmax.f32 %v348_v34, %v408_v36 }
 0x102   : > { %v369_v42 = vadd.f32 %v940_v39, %v1119_v24  ;;  %v360_v43 = vpop.f32.mrb[5].mxu0  ;;  %v440_v44 = vpack.c.bf16 %v426_v38, %v425_v37 }
 0x103   : > { %v361_v45 = vadd.f32 %v1119_v24, %v360_v43  ;;  %v941_v46 = vpop.f32.mrb[6].mxu0  ;;  %v439_v47 = vpack.c.bf16 %v424_v41, %v423_v40 }
 0x104   : > { %v413_v48 = vmul.f32 0.2, %v369_v42  ;;  %v372_v49 = vadd.f32 %v941_v46, %v1119_v24  ;;  %v363_v50 = vpop.f32.mrb[7].mxu0 }
 0x105   : > { %v411_v51 = vmul.f32 0.2, %v361_v45  ;;  %v364_v52 = vadd.f32 %v1119_v24, %v363_v50  ;;  %966 = vmatprep.mubr.bf16.mxu1 %v439_v47 }
 0x106   : > { %v414_v53 = vmul.f32 0.2, %v372_v49  ;;  %967 = vmatmul.mubr.bf16.vlgmr.msra.gmra.mrb[0].mxu1 %v440_v44  ;;  %v429_v55 = vmax.f32 %v369_v42, %v413_v48 }
 0x107   : > { %v412_v54 = vmul.f32 0.2, %v364_v52  ;;  %v427_v57 = vmax.f32 %v361_v45, %v411_v51 }
 0x108   : > { %v430_v56 = vmax.f32 %v372_v49, %v414_v53 }
 0x109   : > { %v428_v58 = vmax.f32 %v364_v52, %v412_v54  ;;  %v944_v59 = vpop.f32.mrb[8].mxu0 }
 0x10a   : > { %v385_v60 = vadd.f32 %v944_v59, %v1119_v24  ;;  %v376_v61 = vpop.f32.mrb[9].mxu0  ;;  %v442_v62 = vpack.c.bf16 %v430_v56, %v429_v55 }
 0x10b   : > { %v377_v63 = vadd.f32 %v1119_v24, %v376_v61  ;;  %v945_v0 = vpop.f32.mrb[10].mxu0  ;;  %v441_v1 = vpack.c.bf16 %v428_v58, %v427_v57 }
 0x10c   : > { %v417_v2 = vmul.f32 0.2, %v385_v60  ;;  %v388_v3 = vadd.f32 %v945_v0, %v1119_v24  ;;  %v379_v4 = vpop.f32.mrb[11].mxu0 }
 0x10d   : > { %v415_v5 = vmul.f32 0.2, %v377_v63  ;;  %v380_v6 = vadd.f32 %v1119_v24, %v379_v4  ;;  %970 = vmatprep.mubr.bf16.mxu1 %v441_v1 }
 0x10e   : > { %v418_v7 = vmul.f32 0.2, %v388_v3  ;;  %971 = vmatmul.mubr.bf16.gmra.mrb[4].mxu1 %v442_v62  ;;  %v433_v9 = vmax.f32 %v385_v60, %v417_v2 }
 0x10f   : > { %v416_v8 = vmul.f32 0.2, %v380_v6  ;;  %v431_v11 = vmax.f32 %v377_v63, %v415_v5 }
 0x110   : > { %v434_v10 = vmax.f32 %v388_v3, %v418_v7 }
 0x111   : > { %v432_v12 = vmax.f32 %v380_v6, %v416_v8  ;;  %v948_v13 = vpop.f32.mrb[12].mxu0 }
 0x112   : > { %v401_v14 = vadd.f32 %v948_v13, %v1119_v24  ;;  %v392_v15 = vpop.f32.mrb[13].mxu0  ;;  %v444_v16 = vpack.c.bf16 %v434_v10, %v433_v9 }
 0x113   : > { %v393_v17 = vadd.f32 %v1119_v24, %v392_v15  ;;  %v949_v18 = vpop.f32.mrb[14].mxu0  ;;  %v443_v19 = vpack.c.bf16 %v432_v12, %v431_v11 }
 0x114   : > { %v421_v20 = vmul.f32 0.2, %v401_v14  ;;  %v404_v21 = vadd.f32 %v949_v18, %v1119_v24  ;;  %v395_v22 = vpop.f32.mrb[15].mxu0 }
 0x115   : > { %v419_v23 = vmul.f32 0.2, %v393_v17  ;;  %v396_v25 = vadd.f32 %v1119_v24, %v395_v22  ;;  %974 = vmatprep.mubr.bf16.mxu1 %v443_v19 }
 0x116   : > { %v422_v26 = vmul.f32 0.2, %v404_v21  ;;  %975 = vmatmul.mubr.bf16.gmra.mrb[8].mxu1 %v444_v16  ;;  %v437_v28 = vmax.f32 %v401_v14, %v421_v20 }
 0x117   : > { %v420_v27 = vmul.f32 0.2, %v396_v25  ;;  %v435_v30 = vmax.f32 %v393_v17, %v419_v23 }
 0x118   : > { %v438_v29 = vmax.f32 %v404_v21, %v422_v26 }
 0x119   : > { %v436_v31 = vmax.f32 %v396_v25, %v420_v27 }
 0x11a   : > { %v446_v32 = vpack.c.bf16 %v438_v29, %v437_v28 }
 0x11b   : > { %v445_v33 = vpack.c.bf16 %v436_v31, %v435_v30 }
 0x11d   : > { %978 = vmatprep.mubr.bf16.mxu1 %v445_v33 }
 0x11e   : > { %979 = vmatmul.mubr.bf16.gmra.mrb[12].mxu1 %v446_v32 }
 0x1d9   : > { %v968_v34 = vpop.f32.mrb[0].mxu1 }
 0x1da   : > { %v554_v36 = vpop.f32.mrb[1].mxu1  ;;  %v563_v37 = vadd.f32 %v968_v34, %v796_v35 }
 0x1db   : > { %v969_v24 = vpop.f32.mrb[2].mxu1  ;;  %v555_v40 = vadd.f32 %v796_v35, %v554_v36 }
 0x1dc   : > { %v566_v38 = vadd.f32 %v969_v24, %v796_v35  ;;  %v557_v39 = vpop.f32.mrb[3].mxu1 }
 0x1dd   : > { %v558_v41 = vadd.f32 %v796_v35, %v557_v39 }
 0x1de   : > { %v847_v42 = vpack.c.bf16 %v566_v38, %v563_v37 }
 0x1df   : > { %v842_v43 = vpack.c.bf16 %v558_v41, %v555_v40 }
 0x1e0   : > { %879 = vst [vmem:[%s1145_s6 + $0x8] sm:$0xff] %v847_v42  }
 0x1e1   : > { %843 = vst [vmem:[%s1145_s6] sm:$0xff] %v842_v43   ;;  %v972_v44 = vpop.f32.mrb[4].mxu1 }
 0x1e2   : > { %v570_v45 = vpop.f32.mrb[5].mxu1  ;;  %v579_v47 = vadd.f32 %v972_v44, %v796_v35 }
 0x1e3   : > { %v973_v46 = vpop.f32.mrb[6].mxu1  ;;  %v571_v50 = vadd.f32 %v796_v35, %v570_v45 }
 0x1e4   : > { %v582_v48 = vadd.f32 %v973_v46, %v796_v35  ;;  %v573_v49 = vpop.f32.mrb[7].mxu1 }
 0x1e5   : > { %v574_v51 = vadd.f32 %v796_v35, %v573_v49 }
 0x1e6   : > { %v857_v52 = vpack.c.bf16 %v582_v48, %v579_v47 }
 0x1e7   : > { %v852_v53 = vpack.c.bf16 %v574_v51, %v571_v50 }
 0x1e8   : > { %881 = vst [vmem:[%s1145_s6 + $0x18] sm:$0xff] %v857_v52  }
 0x1e9   : > { %880 = vst [vmem:[%s1145_s6 + $0x10] sm:$0xff] %v852_v53   ;;  %v976_v54 = vpop.f32.mrb[8].mxu1 }
 0x1ea   : > { %v586_v55 = vpop.f32.mrb[9].mxu1  ;;  %v595_v57 = vadd.f32 %v976_v54, %v796_v35 }
 0x1eb   : > { %v977_v56 = vpop.f32.mrb[10].mxu1  ;;  %v587_v60 = vadd.f32 %v796_v35, %v586_v55 }
 0x1ec   : > { %v598_v58 = vadd.f32 %v977_v56, %v796_v35  ;;  %v589_v59 = vpop.f32.mrb[11].mxu1 }
 0x1ed   : > { %v590_v61 = vadd.f32 %v796_v35, %v589_v59 }
 0x1ee   : > { %v867_v62 = vpack.c.bf16 %v598_v58, %v595_v57 }
 0x1ef   : > { %v862_v63 = vpack.c.bf16 %v590_v61, %v587_v60 }
 0x1f0   : > { %883 = vst [vmem:[%s1145_s6 + $0x28] sm:$0xff] %v867_v62  }
 0x1f1   : > { %882 = vst [vmem:[%s1145_s6 + $0x20] sm:$0xff] %v862_v63   ;;  %v980_v0 = vpop.f32.mrb[12].mxu1 }
 0x1f2   : > { %v602_v1 = vpop.f32.mrb[13].mxu1  ;;  %v611_v3 = vadd.f32 %v980_v0, %v796_v35 }
 0x1f3   : > { %v981_v2 = vpop.f32.mrb[14].mxu1  ;;  %v603_v6 = vadd.f32 %v796_v35, %v602_v1 }
 0x1f4   : > { %v614_v4 = vadd.f32 %v981_v2, %v796_v35  ;;  %v605_v5 = vpop.f32.mrb[15].mxu1 }
 0x1f5   : > { %v606_v7 = vadd.f32 %v796_v35, %v605_v5 }
 0x1f6   : > { %v877_v8 = vpack.c.bf16 %v614_v4, %v611_v3 }
 0x1f7   : > { %v872_v9 = vpack.c.bf16 %v606_v7, %v603_v6 }
 0x1f8   : > { %885 = vst [vmem:[%s1145_s6 + $0x38] sm:$0xff] %v877_v8  }
 0x1f9   : > { %884 = vst [vmem:[%s1145_s6 + $0x30] sm:$0xff] %v872_v9  }
 0x1fa PF: > { %s13_s12 = sadd.s32 1, %s1020_s12  }
 0x1fb   : > { %p10_p4 = scmp.ge.s32.totalorder %s13_s12, 4  }
 0x1fd   :  { %12 = sbr.rel (!%p10_p4) target bundleno = 1 (0x1), region = 64 }

</bundles_post_ra>
